<compile_context>
chip_gen: v7x
topology: tpu7x:2x2x1
jax: 0.10.0
libtpu: 0.0.40
codegen_flags: <defaults>
</compile_context>

<pallas_src>
import functools

import jax
import jax.numpy as jnp
from jax.experimental import pallas as pl
from jax.experimental.pallas import tpu as pltpu

_LANE = 128
_SUBLANE_BF16 = 16          # bf16 packs [16, 128] rows per vreg
_NEG_INF = -1e30            # finite "-inf": exp() underflows to exactly 0 in f32


def _round_up(x, m):
    return ((x + m - 1) // m) * m


def _pad2(x, rows, cols, val=0.0):
    return jnp.pad(x, ((0, rows - x.shape[0]), (0, cols - x.shape[1])),
                   constant_values=val)


def _vmem_capacity_bytes():
    try:
        return int(pltpu.get_tpu_info().vmem_capacity_bytes)
    except Exception:
        return 128 * 1024 * 1024   # v5e / v6e physical VMEM


def _batch_dim_semantics():
    # v7x has 2 TensorCores/chip: CORE_PARALLEL actually shards the batch grid
    # axis across them (plain "parallel" has near-zero measured impact).
    try:
        kind = jax.devices()[0].device_kind.lower()
    except Exception:
        kind = ""
    if "v7" in kind or "7x" in kind:
        return (pltpu.CORE_PARALLEL,)
    return (pltpu.PARALLEL,)


def _resident_spec(shape):
    # Constant index_map -> operand stays VMEM-resident across the batch grid.
    # Single-buffer it (its block index never changes); fall back to the
    # default double-buffered spec if pipeline_mode is unavailable.
    idx = lambda i: (0,) * len(shape)
    try:
        return pl.BlockSpec(shape, idx, pipeline_mode=pl.Buffered(1))
    except Exception:
        return pl.BlockSpec(shape, idx)


def _tile_rows(batch, vmem_cap):
    # Balanced tiles: minimize last-tile waste, align to 16 rows for bf16
    # packing, and amortize the ~0.35us/grid-step overhead with large tiles on
    # 128 MiB-VMEM parts (v5e/v6e) while staying inside v7x's 64 MiB.
    tile_b_max = 512 if vmem_cap <= 96 * 1024 * 1024 else 1024
    n_tiles = max(1, pl.cdiv(batch, tile_b_max))
    return _round_up(pl.cdiv(batch, n_tiles), _SUBLANE_BF16)


def _vmem_limit_bytes(tile_b, e_pad, t_pad, num_labels, supervised, vmem_cap):
    bufs = 2 * 2 * tile_b * e_pad * 4               # doc+ng tiles, 2-buffered f32
    bufs += 2 * e_pad * t_pad * 2 + 2 * t_pad * 4   # resident topic weights/biases
    bufs += 2 * tile_b * 4                          # score tile, double-buffered
    if supervised:
        bufs += t_pad * num_labels * 2 + num_labels * 4   # resident label head
        bufs += 2 * tile_b * num_labels * 4               # label tile, 2-buffered
    # 2x safety margin (covers double-buffered weights if single-buffering is
    # unavailable) + f32 intermediates ([tile_b, t_pad] temporaries) + headroom.
    limit = 2 * bufs + 8 * tile_b * t_pad * 4 + (8 << 20)
    limit = max(limit, 32 << 20)
    return int(min(limit, (vmem_cap * 3) // 4))


# ---------------------------------------------------------------------------
# Kernels
# ---------------------------------------------------------------------------

def _softmax_approx(x):
    # Padded topic lanes carry a -1e30 bias -> exp underflows to exactly 0.
    m = jnp.max(x, axis=-1, keepdims=True)
    e = jnp.exp(x - m)
    return e * pl.reciprocal(jnp.sum(e, axis=-1, keepdims=True), approx=True)


def _softmax_exact(x):
    m = jnp.max(x, axis=-1, keepdims=True)
    e = jnp.exp(x - m)
    return e / jnp.sum(e, axis=-1, keepdims=True)


def _topic_heads(doc_ref, ng_ref, w_ng_ref, b_ng_ref, w_doc_ref, b_doc_ref):
    # f32 embedding tiles are cast to bf16 in-kernel (free VPU work in a
    # mem-bound kernel) so the MXU runs its native bf16 path; accumulation f32.
    doc = doc_ref[...].astype(jnp.bfloat16)
    ng = ng_ref[...].astype(jnp.bfloat16)

    # ngram_topic = sigmoid(ngram_embedding @ W_ng^T + b_ng)      [tb, T_pad]
    ng_logits = jnp.dot(ng, w_ng_ref[...],
                        preferred_element_type=jnp.float32) + b_ng_ref[...]
    ngram_topic = jax.nn.sigmoid(ng_logits)

    # document_topic = softmax(doc_embedding @ W_doc^T + b_doc)   [tb, T_pad]
    doc_logits = jnp.dot(doc, w_doc_ref[...],
                         preferred_element_type=jnp.float32) + b_doc_ref[...]
    document_topic = _softmax_approx(doc_logits)
    return ngram_topic, document_topic


def _ntm_kernel_supervised(doc_ref, ng_ref, w_ng_ref, b_ng_ref,
                           w_doc_ref, b_doc_ref, w_lab_ref, b_lab_ref,
                           score_ref, label_ref):
    ngram_topic, document_topic = _topic_heads(
        doc_ref, ng_ref, w_ng_ref, b_ng_ref, w_doc_ref, b_doc_ref)

    # score = sum(ngram_topic * document_topic, -1)                [tb, 1]
    # (padded sigmoid lanes are 0.5 but multiply exact-0 softmax lanes)
    score_ref[...] = jnp.sum(ngram_topic * document_topic,
                             axis=-1, keepdims=True)

    # label_probs = softmax(document_topic @ W_lab^T + b_lab)      [tb, L]
    # L kept unpadded (tiny writeback); bf16 MXU inputs, f32 accumulate,
    # exact divide so rows sum to exactly 1.
    lab_logits = jnp.dot(document_topic.astype(jnp.bfloat16), w_lab_ref[...],
                         preferred_element_type=jnp.float32) + b_lab_ref[...]
    label_ref[...] = _softmax_exact(lab_logits)


def _ntm_kernel_unsupervised(doc_ref, ng_ref, w_ng_ref, b_ng_ref,
                             w_doc_ref, b_doc_ref, score_ref):
    ngram_topic, document_topic = _topic_heads(
        doc_ref, ng_ref, w_ng_ref, b_ng_ref, w_doc_ref, b_doc_ref)
    score_ref[...] = jnp.sum(ngram_topic * document_topic,
                             axis=-1, keepdims=True)


# ---------------------------------------------------------------------------
# Wrapper
# ---------------------------------------------------------------------------

@functools.partial(jax.jit, static_argnames=("supervised",))
def unified_ntm_forward(doc_embedding, ngram_embedding, params, *, supervised):
    """JAX/Pallas equivalent of UnifiedNeuralTopicModel.forward."""
    B, E = doc_embedding.shape
    T = params["w_ng_t"].shape[1]

    e_pad = _round_up(E, _SUBLANE_BF16)   # bf16 weight sublane packing
    t_pad = _round_up(T, _LANE)           # lane-dense topic vregs / MXU tiles

    vmem_cap = _vmem_capacity_bytes()
    tile_b = _tile_rows(B, vmem_cap)
    grid = (pl.cdiv(B, tile_b),)          # partial last block handled by Pallas

    # Embeddings stream straight from their producer: no pad/cast HBM
    # round-trip.  E is only padded when it is not already 16-aligned.
    doc = doc_embedding
    ng = ngram_embedding
    if e_pad != E:
        doc = _pad2(doc, B, e_pad)
        ng = _pad2(ng, B, e_pad)

    # Tiny resident weights: padded + cast once.  Zero weight columns ->
    # sigmoid(0)=0.5 lanes that multiply exact-zero softmax lanes; -1e30 bias
    # columns -> exact-zero softmax lanes.
    w_ng = _pad2(params["w_ng_t"], e_pad, t_pad).astype(jnp.bfloat16)
    b_ng = _pad2(params["b_ng"], 1, t_pad).astype(jnp.float32)
    w_doc = _pad2(params["w_doc_t"], e_pad, t_pad).astype(jnp.bfloat16)
    b_doc = _pad2(params["b_doc"], 1, t_pad, _NEG_INF).astype(jnp.float32)

    emb_spec = pl.BlockSpec((tile_b, e_pad), lambda i: (i, 0))
    w_spec = _resident_spec((e_pad, t_pad))
    b_spec = _resident_spec((1, t_pad))
    score_spec = pl.BlockSpec((tile_b, 1), lambda i: (i, 0))

    if supervised:
        L = params["w_lab_t"].shape[1]
        w_lab = _pad2(params["w_lab_t"], t_pad, L).astype(jnp.bfloat16)
        b_lab = params["b_lab"].reshape(1, L).astype(jnp.float32)

        w_lab_spec = _resident_spec((t_pad, L))
        b_lab_spec = _resident_spec((1, L))
        label_spec = pl.BlockSpec((tile_b, L), lambda i: (i, 0))

        compiler_params = pltpu.CompilerParams(
            dimension_semantics=_batch_dim_semantics(),
            vmem_limit_bytes=_vmem_limit_bytes(tile_b, e_pad, t_pad, L,
                                               True, vmem_cap))
        cost = pl.CostEstimate(
            flops=4 * B * e_pad * t_pad + 2 * B * t_pad * L,
            transcendentals=B * (2 * t_pad + L),
            bytes_accessed=(2 * B * e_pad * 4
                            + 2 * e_pad * t_pad * 2 + 2 * t_pad * 4
                            + t_pad * L * 2 + L * 4
                            + B * 4 + B * L * 4))

        score, label_probs = pl.pallas_call(
            _ntm_kernel_supervised,
            grid=grid,
            out_shape=(jax.ShapeDtypeStruct((B, 1), jnp.float32),
                       jax.ShapeDtypeStruct((B, L), jnp.float32)),
            in_specs=[emb_spec, emb_spec, w_spec, b_spec, w_spec, b_spec,
                      w_lab_spec, b_lab_spec],
            out_specs=(score_spec, label_spec),
            compiler_params=compiler_params,
            cost_estimate=cost,
        )(doc, ng, w_ng, b_ng, w_doc, b_doc, w_lab, b_lab)
        return score[:, 0], label_probs

    compiler_params = pltpu.CompilerParams(
        dimension_semantics=_batch_dim_semantics(),
        vmem_limit_bytes=_vmem_limit_bytes(tile_b, e_pad, t_pad, 0,
                                           False, vmem_cap))
    cost = pl.CostEstimate(
        flops=4 * B * e_pad * t_pad,
        transcendentals=2 * B * t_pad,
        bytes_accessed=(2 * B * e_pad * 4 + 2 * e_pad * t_pad * 2
                        + 2 * t_pad * 4 + B * 4))

    score = pl.pallas_call(
        _ntm_kernel_unsupervised,
        grid=grid,
        out_shape=jax.ShapeDtypeStruct((B, 1), jnp.float32),
        in_specs=[emb_spec, emb_spec, w_spec, b_spec, w_spec, b_spec],
        out_specs=score_spec,
        compiler_params=compiler_params,
        cost_estimate=cost,
    )(doc, ng, w_ng, b_ng, w_doc, b_doc)
    return score[:, 0]


# ---------------------------------------------------------------------------
# Params / reference
# ---------------------------------------------------------------------------

def init_params(key, embedding_dim, topic_dim, num_labels=None):
    """PyTorch nn.Linear-style init (uniform +-1/sqrt(fan_in)).
    Weights stored transposed: [in_features, out_features]."""
    ks = jax.random.split(key, 6)

    def linear(kw, kb, fan_in, fan_out):
        bound = 1.0 / jnp.sqrt(fan_in)
        w_t = jax.random.uniform(kw, (fan_in, fan_out), jnp.float32,
                                 -bound, bound)
        b = jax.random.uniform(kb, (1, fan_out), jnp.float32, -bound, bound)
        return w_t, b

    w_ng_t, b_ng = linear(ks[0], ks[1], embedding_dim, topic_dim)
    w_doc_t, b_doc = linear(ks[2], ks[3], embedding_dim, topic_dim)
    params = {"w_ng_t": w_ng_t, "b_ng": b_ng,
              "w_doc_t": w_doc_t, "b_doc": b_doc}
    if num_labels is not None:
        w_lab_t, b_lab = linear(ks[4], ks[5], topic_dim, num_labels)
        params["w_lab_t"] = w_lab_t
        params["b_lab"] = b_lab
    return params


def _reference_forward(doc, ng, params, supervised):
    ngram_topic = jax.nn.sigmoid(ng @ params["w_ng_t"] + params["b_ng"])
    document_topic = jax.nn.softmax(doc @ params["w_doc_t"] + params["b_doc"],
                                    axis=-1)
    score = jnp.sum(ngram_topic * document_topic, axis=-1)
    if supervised:
        logits = document_topic @ params["w_lab_t"] + params["b_lab"]
        return score, jax.nn.softmax(logits, axis=-1)
    return score


if __name__ == "__main__":
    batch = 32                 # 16-aligned -> block == array, no partial tile
    embedding_dim = 32
    topic_dim = 16
    num_labels = 8

    key = jax.random.PRNGKey(0)
    k_doc, k_ng, k_params = jax.random.split(key, 3)

    doc_embedding = jax.random.normal(k_doc, (batch, embedding_dim),
                                      jnp.float32)
    ngram_embedding = jax.random.normal(k_ng, (batch, embedding_dim),
                                        jnp.float32)

    # Tolerances relaxed for bf16 MXU inputs + approx reciprocal (intentional
    # accuracy/bandwidth trade-off).
    ATOL = RTOL = 2e-2

    # Supervised mode (num_labels given) -> (score, label_probs).
    params_sup = init_params(k_params, embedding_dim, topic_dim, num_labels)
    score, label_probs = unified_ntm_forward(
        doc_embedding, ngram_embedding, params_sup, supervised=True)
    jax.block_until_ready(score)
    jax.block_until_ready(label_probs)

    ref_score, ref_probs = _reference_forward(
        doc_embedding, ngram_embedding, params_sup, supervised=True)
    assert score.shape == (batch,)
    assert label_probs.shape == (batch, num_labels)
    assert jnp.allclose(score, ref_score, atol=ATOL, rtol=RTOL)
    assert jnp.allclose(label_probs, ref_probs, atol=ATOL, rtol=RTOL)
    assert jnp.allclose(jnp.sum(label_probs, axis=-1), 1.0, atol=1e-3)

    # Unsupervised mode (num_labels=None) -> score only.
    params_unsup = init_params(k_params, embedding_dim, topic_dim, None)
    score_u = unified_ntm_forward(
        doc_embedding, ngram_embedding, params_unsup, supervised=False)
    jax.block_until_ready(score_u)
    ref_score_u = _reference_forward(
        doc_embedding, ngram_embedding, params_unsup, supervised=False)
    assert jnp.allclose(score_u, ref_score_u, atol=ATOL, rtol=RTOL)

    print("KERNEL_OK")
</pallas_src>

<mosaic_0001>
module attributes {stable_mosaic.version = 11 : i64} {
  func.func @_ntm_kernel_supervised(%arg0: i32, %arg1: memref<32x32xf32, #tpu.memory_space<vmem>>, %arg2: memref<32x32xf32, #tpu.memory_space<vmem>>, %arg3: memref<32x128xbf16, #tpu.memory_space<vmem>>, %arg4: memref<1x128xf32, #tpu.memory_space<vmem>>, %arg5: memref<32x128xbf16, #tpu.memory_space<vmem>>, %arg6: memref<1x128xf32, #tpu.memory_space<vmem>>, %arg7: memref<128x8xbf16, #tpu.memory_space<vmem>>, %arg8: memref<1x8xf32, #tpu.memory_space<vmem>>, %arg9: memref<32x1xf32, #tpu.memory_space<vmem>>, %arg10: memref<32x8xf32, #tpu.memory_space<vmem>>) attributes {dimension_semantics = [#tpu.dimension_semantics<parallel>], iteration_bounds = array<i64: 1>, scalar_prefetch = 0 : i64, scratch_operands = 0 : i64, tpu.core_type = #tpu.core_type<tc>, window_params = [{transform_indices = @transform_0, window_bounds = array<i64: 32, 32>}, {transform_indices = @transform_1, window_bounds = array<i64: 32, 32>}, {pipeline_mode = #tpu.pipeline_mode<synchronous>, transform_indices = @transform_2, window_bounds = array<i64: 32, 128>}, {pipeline_mode = #tpu.pipeline_mode<synchronous>, transform_indices = @transform_3, window_bounds = array<i64: 1, 128>}, {pipeline_mode = #tpu.pipeline_mode<synchronous>, transform_indices = @transform_4, window_bounds = array<i64: 32, 128>}, {pipeline_mode = #tpu.pipeline_mode<synchronous>, transform_indices = @transform_5, window_bounds = array<i64: 1, 128>}, {pipeline_mode = #tpu.pipeline_mode<synchronous>, transform_indices = @transform_6, window_bounds = array<i64: 128, 8>}, {pipeline_mode = #tpu.pipeline_mode<synchronous>, transform_indices = @transform_7, window_bounds = array<i64: 1, 8>}, {transform_indices = @transform_8, window_bounds = array<i64: 32, 1>}, {transform_indices = @transform_9, window_bounds = array<i64: 32, 8>}]} {
    %c0 = arith.constant 0 : index
    %c0_0 = arith.constant 0 : index
    %0 = vector.load %arg1[%c0, %c0_0] : memref<32x32xf32, #tpu.memory_space<vmem>>, vector<32x32xf32>
    %1 = arith.truncf %0 : vector<32x32xf32> to vector<32x32xbf16>
    %c0_1 = arith.constant 0 : index
    %c0_2 = arith.constant 0 : index
    %2 = vector.load %arg2[%c0_1, %c0_2] : memref<32x32xf32, #tpu.memory_space<vmem>>, vector<32x32xf32>
    %3 = arith.truncf %2 : vector<32x32xf32> to vector<32x32xbf16>
    %c0_3 = arith.constant 0 : index
    %c0_4 = arith.constant 0 : index
    %4 = vector.load %arg3[%c0_3, %c0_4] : memref<32x128xbf16, #tpu.memory_space<vmem>>, vector<32x128xbf16>
    %cst = arith.constant dense<0.000000e+00> : vector<32x128xf32>
    %5 = tpu.matmul %3, %4, %cst {dimension_numbers = #tpu.dot_dimension_numbers<[1], [0], [0], [1], [0, 0, 1, 1], [], []>} : vector<32x32xbf16>, vector<32x128xbf16>, vector<32x128xf32> -> vector<32x128xf32>
    %c0_5 = arith.constant 0 : index
    %c0_6 = arith.constant 0 : index
    %6 = vector.load %arg4[%c0_5, %c0_6] : memref<1x128xf32, #tpu.memory_space<vmem>>, vector<1x128xf32>
    %7 = vector.broadcast %6 : vector<1x128xf32> to vector<32x128xf32>
    %8 = arith.addf %5, %7 : vector<32x128xf32>
    %9 = arith.negf %8 : vector<32x128xf32>
    %10 = math.exp %9 : vector<32x128xf32>
    %cst_7 = arith.constant 1.000000e+00 : f32
    %11 = vector.broadcast %cst_7 : f32 to vector<32x128xf32>
    %12 = arith.addf %11, %10 : vector<32x128xf32>
    %13 = arith.divf %11, %12 : vector<32x128xf32>
    %c0_8 = arith.constant 0 : index
    %c0_9 = arith.constant 0 : index
    %14 = vector.load %arg5[%c0_8, %c0_9] : memref<32x128xbf16, #tpu.memory_space<vmem>>, vector<32x128xbf16>
    %cst_10 = arith.constant dense<0.000000e+00> : vector<32x128xf32>
    %15 = tpu.matmul %1, %14, %cst_10 {dimension_numbers = #tpu.dot_dimension_numbers<[1], [0], [0], [1], [0, 0, 1, 1], [], []>} : vector<32x32xbf16>, vector<32x128xbf16>, vector<32x128xf32> -> vector<32x128xf32>
    %c0_11 = arith.constant 0 : index
    %c0_12 = arith.constant 0 : index
    %16 = vector.load %arg6[%c0_11, %c0_12] : memref<1x128xf32, #tpu.memory_space<vmem>>, vector<1x128xf32>
    %17 = vector.broadcast %16 : vector<1x128xf32> to vector<32x128xf32>
    %18 = arith.addf %15, %17 : vector<32x128xf32>
    %cst_13 = arith.constant dense<0xFF800000> : vector<32xf32>
    %19 = vector.multi_reduction <maximumf>, %18, %cst_13 [1] : vector<32x128xf32> to vector<32xf32>
    %20 = vector.shape_cast %19 : vector<32xf32> to vector<32x1xf32>
    %21 = vector.broadcast %20 : vector<32x1xf32> to vector<32x128xf32>
    %22 = arith.subf %18, %21 : vector<32x128xf32>
    %23 = math.exp %22 : vector<32x128xf32>
    %cst_14 = arith.constant dense<0.000000e+00> : vector<32xf32>
    %24 = vector.multi_reduction <add>, %23, %cst_14 [1] : vector<32x128xf32> to vector<32xf32>
    %25 = vector.shape_cast %24 : vector<32xf32> to vector<32x1xf32>
    %26 = tpu.reciprocal %25 {approx = true} : vector<32x1xf32> -> vector<32x1xf32>
    %27 = vector.broadcast %26 : vector<32x1xf32> to vector<32x128xf32>
    %28 = arith.mulf %23, %27 : vector<32x128xf32>
    %29 = arith.mulf %13, %28 : vector<32x128xf32>
    %cst_15 = arith.constant dense<0.000000e+00> : vector<32xf32>
    %30 = vector.multi_reduction <add>, %29, %cst_15 [1] : vector<32x128xf32> to vector<32xf32>
    %31 = vector.shape_cast %30 : vector<32xf32> to vector<32x1xf32>
    %c0_16 = arith.constant 0 : index
    %c0_17 = arith.constant 0 : index
    %32 = vector.load %arg9[%c0_16, %c0_17] : memref<32x1xf32, #tpu.memory_space<vmem>>, vector<32x1xf32>
    tpu.vector_store %arg9[%c0_16, %c0_17], %31 {strides = array<i32>} : memref<32x1xf32, #tpu.memory_space<vmem>>, vector<32x1xf32>,
    %33 = arith.truncf %28 : vector<32x128xf32> to vector<32x128xbf16>
    %c0_18 = arith.constant 0 : index
    %c0_19 = arith.constant 0 : index
    %34 = vector.load %arg7[%c0_18, %c0_19] : memref<128x8xbf16, #tpu.memory_space<vmem>>, vector<128x8xbf16>
    %cst_20 = arith.constant dense<0.000000e+00> : vector<32x8xf32>
    %35 = tpu.matmul %33, %34, %cst_20 {dimension_numbers = #tpu.dot_dimension_numbers<[1], [0], [0], [1], [0, 0, 1, 1], [], []>} : vector<32x128xbf16>, vector<128x8xbf16>, vector<32x8xf32> -> vector<32x8xf32>
    %c0_21 = arith.constant 0 : index
    %c0_22 = arith.constant 0 : index
    %36 = vector.load %arg8[%c0_21, %c0_22] : memref<1x8xf32, #tpu.memory_space<vmem>>, vector<1x8xf32>
    %37 = vector.broadcast %36 : vector<1x8xf32> to vector<32x8xf32>
    %38 = arith.addf %35, %37 : vector<32x8xf32>
    %cst_23 = arith.constant dense<0xFF800000> : vector<32xf32>
    %39 = vector.multi_reduction <maximumf>, %38, %cst_23 [1] : vector<32x8xf32> to vector<32xf32>
    %40 = vector.shape_cast %39 : vector<32xf32> to vector<32x1xf32>
    %41 = vector.broadcast %40 : vector<32x1xf32> to vector<32x8xf32>
    %42 = arith.subf %38, %41 : vector<32x8xf32>
    %43 = math.exp %42 : vector<32x8xf32>
    %cst_24 = arith.constant dense<0.000000e+00> : vector<32xf32>
    %44 = vector.multi_reduction <add>, %43, %cst_24 [1] : vector<32x8xf32> to vector<32xf32>
    %45 = vector.shape_cast %44 : vector<32xf32> to vector<32x1xf32>
    %46 = vector.broadcast %45 : vector<32x1xf32> to vector<32x8xf32>
    %47 = arith.divf %43, %46 : vector<32x8xf32>
    %c0_25 = arith.constant 0 : index
    %c0_26 = arith.constant 0 : index
    %48 = vector.load %arg10[%c0_25, %c0_26] : memref<32x8xf32, #tpu.memory_space<vmem>>, vector<32x8xf32>
    tpu.vector_store %arg10[%c0_25, %c0_26], %47 {strides = array<i32>} : memref<32x8xf32, #tpu.memory_space<vmem>>, vector<32x8xf32>,
    return
  }
  func.func @transform_0(%arg0: i32) -> (i32, i32) {
    %c0_i32 = arith.constant 0 : i32
    %c0_i32_0 = arith.constant 0 : i32
    return %arg0, %c0_i32 : i32, i32
  }
  func.func @transform_1(%arg0: i32) -> (i32, i32) {
    %c0_i32 = arith.constant 0 : i32
    %c0_i32_0 = arith.constant 0 : i32
    return %arg0, %c0_i32 : i32, i32
  }
  func.func @transform_2(%arg0: i32) -> (i32, i32) {
    %c0_i32 = arith.constant 0 : i32
    %c0_i32_0 = arith.constant 0 : i32
    %c0_i32_1 = arith.constant 0 : i32
    return %c0_i32, %c0_i32_0 : i32, i32
  }
  func.func @transform_3(%arg0: i32) -> (i32, i32) {
    %c0_i32 = arith.constant 0 : i32
    %c0_i32_0 = arith.constant 0 : i32
    %c0_i32_1 = arith.constant 0 : i32
    return %c0_i32, %c0_i32_0 : i32, i32
  }
  func.func @transform_4(%arg0: i32) -> (i32, i32) {
    %c0_i32 = arith.constant 0 : i32
    %c0_i32_0 = arith.constant 0 : i32
    %c0_i32_1 = arith.constant 0 : i32
    return %c0_i32, %c0_i32_0 : i32, i32
  }
  func.func @transform_5(%arg0: i32) -> (i32, i32) {
    %c0_i32 = arith.constant 0 : i32
    %c0_i32_0 = arith.constant 0 : i32
    %c0_i32_1 = arith.constant 0 : i32
    return %c0_i32, %c0_i32_0 : i32, i32
  }
  func.func @transform_6(%arg0: i32) -> (i32, i32) {
    %c0_i32 = arith.constant 0 : i32
    %c0_i32_0 = arith.constant 0 : i32
    %c0_i32_1 = arith.constant 0 : i32
    return %c0_i32, %c0_i32_0 : i32, i32
  }
  func.func @transform_7(%arg0: i32) -> (i32, i32) {
    %c0_i32 = arith.constant 0 : i32
    %c0_i32_0 = arith.constant 0 : i32
    %c0_i32_1 = arith.constant 0 : i32
    return %c0_i32, %c0_i32_0 : i32, i32
  }
  func.func @transform_8(%arg0: i32) -> (i32, i32) {
    %c0_i32 = arith.constant 0 : i32
    %c0_i32_0 = arith.constant 0 : i32
    return %arg0, %c0_i32 : i32, i32
  }
  func.func @transform_9(%arg0: i32) -> (i32, i32) {
    %c0_i32 = arith.constant 0 : i32
    %c0_i32_0 = arith.constant 0 : i32
    return %arg0, %c0_i32 : i32, i32
  }
}

</mosaic_0001>

<bundles_post_ra>
// kernel: unified_ntm_forward.1
= control target key start
LH: loop header
LB: loop body
LE: loop exit
PB: predicated region body
PF: predicated region fallthrough
CT: control target
= control target key end

     0   :  { %vm67_vm0 = vcmask 261120   ;;  %vm400_vm1 = vcmask 64512   ;;  %vm273_vm2 = vcmask 7168   ;;  %s780_s2 = inlined_call_operand.vmem [shape: bf16[32,128], index: 2, kind: input, shape index: {}]   ;;  %s781_s1 = inlined_call_operand.vmem [shape: f32[32,32], index: 1, kind: input, shape index: {}]   ;;  %s782_s4 = inlined_call_operand.vmem [shape: bf16[32,128], index: 4, kind: input, shape index: {}]   ;;  %s783_s0 = inlined_call_operand.vmem [shape: f32[32,32], index: 0, kind: input, shape index: {}]   ;;  %s784_s5 = inlined_call_operand.vmem [shape: f32[1,128], index: 5, kind: input, shape index: {}]   ;;  %s785_s6 = inlined_call_operand.vmem [shape: bf16[128,8], index: 6, kind: input, shape index: {}]   ;;  %s786_s3 = inlined_call_operand.vmem [shape: f32[1,128], index: 3, kind: input, shape index: {}]   ;;  %s787_s7 = inlined_call_operand.vmem [shape: f32[1,8], index: 7, kind: input, shape index: {}]   ;;  %s788_s8 = inlined_call_operand.vmem [shape: f32[32,1], index: 8, kind: output, shape index: {0}]   ;;  %s789_s9 = inlined_call_operand.vmem [shape: f32[32,8], index: 9, kind: output, shape index: {1}]  }
   0x1   :  { %v534_v0 = vld [vmem:[%s780_s2] sm:$0xff]   ;;  %v535_v1 = vld [vmem:[%s780_s2 + $0x8] sm:$0xff]   ;;  %v40_v4 = vld [vmem:[%s781_s1 + $0x10] sm:$0xff] }
   0x2   :  { %498 = vmatprep.subr.bf16.mxu1 %v534_v0  ;;  %v38_v2 = vld [vmem:[%s781_s1] sm:$0xff]  ;;  %v39_v3 = vld [vmem:[%s781_s1 + $0x8] sm:$0xff]  ;;  %v41_v6 = vld [vmem:[%s781_s1 + $0x18] sm:$0xff] }
   0x3   :  { %499 = vmatpush3.bf16.msra.mxu1 %v534_v0  ;;  %v42_v5 = vpack.c.bf16 %v39_v3, %v38_v2  ;;  %v536_v7 = vld [vmem:[%s782_s4] sm:$0xff]   ;;  %v33_v9 = vld [vmem:[%s783_s0 + $0x8] sm:$0xff]  ;;  %v43_v10 = vpack.c.bf16 %v41_v6, %v40_v4  ;;  %v34_v13 = vld [vmem:[%s783_s0 + $0x10] sm:$0xff] }
   0x4   :  { %500 = vmatprep.subr.bf16.mxu1 %v535_v1  ;;  %v32_v8 = vld [vmem:[%s783_s0] sm:$0xff]  ;;  %v537_v12 = vld [vmem:[%s782_s4 + $0x8] sm:$0xff]   ;;  %v35_v14 = vld [vmem:[%s783_s0 + $0x18] sm:$0xff] }
   0x5   :  { %502 = vmatprep.mubr.msk.bf16.mxu1 %vm67_vm0, %v42_v5  ;;  %v36_v11 = vpack.c.bf16 %v33_v9, %v32_v8  ;;  %v37_v15 = vpack.c.bf16 %v35_v14, %v34_v13  ;;  %v466_v20 = vld [vmem:[%s784_s5] ss:$0 sm:$0xff]  ;;  %v539_v30 = vld [vmem:[%s785_s6 + $0x8] sm:$0xff]   ;;  %v540_v31 = vld [vmem:[%s785_s6 + $0x10] sm:$0xff]  }
   0x6   :  { %v538_v29 = vld [vmem:[%s785_s6] sm:$0xff]   ;;  %v541_v48 = vld [vmem:[%s785_s6 + $0x18] sm:$0xff]   ;;  %v543_v50 = vld [vmem:[%s785_s6 + $0x28] sm:$0xff]  }
   0x7   :  { %501 = vmatpush3.bf16.msra.mxu1 %v535_v1  ;;  %514 = vmatprep.subr.bf16.mxu0 %v538_v29  ;;  %v542_v49 = vld [vmem:[%s785_s6 + $0x20] sm:$0xff]   ;;  %v544_v51 = vld [vmem:[%s785_s6 + $0x30] sm:$0xff]   ;;  %v545_v52 = vld [vmem:[%s785_s6 + $0x38] sm:$0xff]  }
   0x8   :  { %506 = vmatprep.subr.bf16.mxu1 %v536_v7  ;;  %515 = vmatpush3.bf16.msra.mxu0 %v538_v29  ;;  %v457_v53 = vld [vmem:[%s786_s3] ss:$0 sm:$0xff] }
   0x9   :  { %516 = vmatprep.subr.bf16.mxu0 %v539_v30 }
   0xa   :  { %503 = vmatmul.mubr.msk.bf16.vlgmr.msra.gmra.mrb[0].mxu1 %vm67_vm0, %v43_v10 }
   0xb   :  { %507 = vmatpush3.bf16.msra.mxu1 %v536_v7  ;;  %510 = vmatprep.mubr.msk.bf16.mxu1 %vm67_vm0, %v36_v11 }
   0xc   :  { %508 = vmatprep.subr.bf16.mxu1 %v537_v12  ;;  %517 = vmatpush3.bf16.msra.mxu0 %v539_v30 }
   0xd   :  { %518 = vmatprep.subr.bf16.mxu0 %v540_v31 }
   0xf   :  { %509 = vmatpush3.bf16.msra.mxu1 %v537_v12 }
  0x10   :  { %519 = vmatpush3.bf16.msra.mxu0 %v540_v31 }
  0x11   :  { %520 = vmatprep.subr.bf16.mxu0 %v541_v48 }
  0x12   :  { %511 = vmatmul.mubr.msk.bf16.vlgmr.msra.gmra.mrb[4].mxu1 %vm67_vm0, %v37_v15 }
  0x14   :  { %521 = vmatpush3.bf16.msra.mxu0 %v541_v48 }
  0x15   :  { %522 = vmatprep.subr.bf16.mxu0 %v542_v49 }
  0x18   :  { %523 = vmatpush3.bf16.msra.mxu0 %v542_v49 }
  0x19   :  { %524 = vmatprep.subr.bf16.mxu0 %v543_v50 }
  0x1c   :  { %525 = vmatpush3.bf16.msra.mxu0 %v543_v50 }
  0x1d   :  { %526 = vmatprep.subr.bf16.mxu0 %v544_v51 }
  0x20   :  { %527 = vmatpush3.bf16.msra.mxu0 %v544_v51 }
  0x21   :  { %528 = vmatprep.subr.bf16.mxu0 %v545_v52 }
  0x24   :  { %529 = vmatpush3.bf16.msra.mxu0 %v545_v52 }
  0xdd   :  { %v684_v16 = vpop.f32.mrb[0].mxu1 }
  0xde   :  { %v686_v17 = vpop.f32.mrb[1].mxu1  ;;  %v117_v57 = vadd.f32 %v684_v16, %v457_v53 }
  0xdf   :  { %v688_v18 = vpop.f32.mrb[2].mxu1  ;;  %v109_v54 = vadd.f32 %v457_v53, %v686_v17 }
  0xe0   :  { %v690_v19 = vpop.f32.mrb[3].mxu1  ;;  %v120_v58 = vadd.f32 %v688_v18, %v457_v53  ;;  %v464_v60 = vmul.f32 -1.442695, %v117_v57 }
  0xe1   :  { %v462_v55 = vmul.f32 -1.442695, %v109_v54  ;;  %v112_v56 = vadd.f32 %v457_v53, %v690_v19 }
  0xe2   :  { %v465_v61 = vmul.f32 -1.442695, %v120_v58 }
  0xe3   :  { %v463_v59 = vmul.f32 -1.442695, %v112_v56 }
  0xe5   :  { %v512_v21 = vpop.f32.mrb[4].mxu1 }
  0xe6   :  { %v219_v22 = vadd.f32 %v512_v21, %v466_v20  ;;  %v210_v23 = vpop.f32.mrb[5].mxu1 }
  0xe7   :  { %v211_v24 = vadd.f32 %v466_v20, %v210_v23  ;;  %v513_v25 = vpop.f32.mrb[6].mxu1 }
  0xe8   :  { %229 = vmax.xlane.f32.xlu1 %v219_v22  ;;  %v213_v26 = vpop.f32.mrb[7].mxu1  ;;  %v222_v27 = vadd.f32 %v513_v25, %v466_v20 }
  0xe9   :  { %225 = vmax.xlane.f32.xlu0 %v211_v24  ;;  %v214_v28 = vadd.f32 %v466_v20, %v213_v26 }
  0xec   :  { %231 = vmax.xlane.f32.xlu1 %v222_v27 }
  0xed   :  { %227 = vmax.xlane.f32.xlu0 %v214_v28 }
 0x175   :  { %v230_v32 = vpop.xlane.xlu1 %229 }
 0x176   :  { %v235_v33 = vsub.f32 %v219_v22, %v230_v32  ;;  %v226_v34 = vpop.xlane.xlu0 %225 }
 0x177   :  { %v233_v35 = vsub.f32 %v211_v24, %v226_v34 }
 0x178   :  { %v241_v38 = vmul.f32 1.442695, %v235_v33 }
 0x179   :  { %v237_v36 = vmul.f32 1.442695, %v233_v35  ;;  %v232_v37 = vpop.xlane.xlu1 %231 }
 0x17a   :  { %v228_v39 = vpop.xlane.xlu0 %227  ;;  %v236_v40 = vsub.f32 %v222_v27, %v232_v37 }
 0x17b   :  { %546 = vpow2.f32 %v237_v36  ;;  %v234_v41 = vsub.f32 %v214_v28, %v228_v39  ;;  %v471_v28 = vld [vmem:[%s787_s7] ss:$0 sm:$0xff] }
 0x17c   :  { %548 = vpow2.f32 %v241_v38  ;;  %v243_v43 = vmul.f32 1.442695, %v236_v40 }
 0x17d   :  { %v239_v42 = vmul.f32 1.442695, %v234_v41 }
 0x17f   :  { %550 = vpow2.f32 %v239_v42 }
 0x180   :  { %552 = vpow2.f32 %v243_v43 }
 0x181   :  { %554 = vpow2.f32 %v462_v55 }
 0x182   :  { %556 = vpow2.f32 %v463_v59 }
 0x183   :  { %558 = vpow2.f32 %v464_v60 }
 0x184   :  { %560 = vpow2.f32 %v465_v61 }
 0x185   :  { %v547_v44 = vpop.eup %546 }
 0x186   :  { %245 = vadd.xlane.f32.xlu0 %v547_v44  ;;  %v704_v45 = vpop.eup %548 }
 0x189   :  { %v551_v46 = vpop.eup %550 }
 0x18a   :  { %249 = vadd.xlane.f32.xlu0 %v704_v45  ;;  %247 = vadd.xlane.f32.xlu1 %v551_v46  ;;  %v707_v47 = vpop.eup %552 }
 0x18b   :  { %v555_v62 = vpop.eup %554 }
 0x18c   :  { %v135_v63 = vadd.f32 1.0, %v555_v62  ;;  %v557_v0 = vpop.eup %556 }
 0x18d   :  { %v559_v2 = vpop.eup %558  ;;  %v136_v3 = vadd.f32 1.0, %v557_v0 }
 0x18e   :  { %251 = vadd.xlane.f32.xlu1 %v707_v47  ;;  %v561_v4 = vpop.eup %560  ;;  %v137_v5 = vadd.f32 1.0, %v559_v2 }
 0x18f   :  { %v138_v8 = vadd.f32 1.0, %v561_v4 }
 0x213   :  { %v246_v1 = vpop.xlane.xlu0 %245 }
 0x214   :  { %562 = vrcp.f32 %v246_v1 }
 0x215   :  { %564 = vrcp.f32 %v135_v63 }
 0x217   :  { %v248_v6 = vpop.xlane.xlu1 %247  ;;  %v250_v7 = vpop.xlane.xlu0 %249 }
 0x218   :  { %566 = vrcp.f32 %v248_v6 }
 0x219   :  { %568 = vrcp.f32 %v250_v7 }
 0x21a   :  { %570 = vrcp.f32 %v136_v3 }
 0x21b   :  { %572 = vrcp.f32 %v137_v5  ;;  %v252_v9 = vpop.xlane.xlu1 %251 }
 0x21c   :  { %574 = vrcp.f32 %v252_v9 }
 0x21d   :  { %576 = vrcp.f32 %v138_v8 }
 0x21e   :  { %v563_v10 = vpop.eup %562 }
 0x21f   :  { %v257_v11 = vmul.f32 %v563_v10, %v547_v44  ;;  %v565_v12 = vpop.eup %564 }
 0x221   :  { %v732_v13 = vmul.f32 %v565_v12, %v257_v11 }
 0x222   :  { %v567_v14 = vpop.eup %566 }
 0x223   :  { %v569_v15 = vpop.eup %568  ;;  %v258_v16 = vmul.f32 %v567_v14, %v551_v46 }
 0x224   :  { %v571_v17 = vpop.eup %570  ;;  %v259_v18 = vmul.f32 %v569_v15, %v704_v45 }
 0x225   :  { %v573_v19 = vpop.eup %572  ;;  %v278_v20 = vpack.c.bf16 %v258_v16, %v257_v11  ;;  %v262_v21 = vmul.f32 %v571_v17, %v258_v16 }
 0x226   :  { %v575_v22 = vpop.eup %574  ;;  %v263_v23 = vmul.f32 %v573_v19, %v259_v18 }
 0x227   :  { %530 = vmatprep.mubr.bf16.mxu0 %v278_v20  ;;  %v260_v24 = vmul.f32 %v575_v22, %v707_v47  ;;  %v577_v25 = vpop.eup %576 }
 0x229   :  { %v279_v26 = vpack.c.bf16 %v260_v24, %v259_v18  ;;  %v264_v27 = vmul.f32 %v577_v25, %v260_v24 }
 0x22b   :  { %531 = vmatmul.mubr.bf16.vlgmr.msra.gmra.mrb[0].mxu0 %v279_v26 }
 0x2fe   :  { %v532_v29 = vpop.f32.mrb[0].mxu0 }
 0x2ff   :  { %v385_v30 = vpop.f32.mrb[1].mxu0  ;;  %v394_v34 = vadd.f32 %v532_v29, %v471_v28 }
 0x300   :  { %v386_v31 = vadd.f32 %v471_v28, %v385_v30  ;;  %v533_v32 = vpop.f32.mrb[2].mxu0 }
 0x301   :  { %v388_v33 = vpop.f32.mrb[3].mxu0  ;;  %v397_v37 = vadd.f32 %v533_v32, %v471_v28  ;;  %v407_v39 = vsel %vm400_vm1, %v394_v34, -inf }
 0x302   :  { %v389_v35 = vadd.f32 %v471_v28, %v388_v33  ;;  %v401_v36 = vsel %vm400_vm1, %v386_v31, -inf }
 0x303   :  { %402 = vmax.xlane.f32.xlu0 %v401_v36  ;;  %v410_v40 = vsel %vm400_vm1, %v397_v37, -inf }
 0x304   :  { %v404_v38 = vsel %vm400_vm1, %v389_v35, -inf }
 0x305   :  { %405 = vmax.xlane.f32.xlu1 %v404_v38 }
 0x307   :  { %408 = vmax.xlane.f32.xlu0 %v407_v39 }
 0x309   :  { %411 = vmax.xlane.f32.xlu1 %v410_v40 }
 0x390   :  { %v403_v41 = vpop.xlane.xlu0 %402 }
 0x391   :  { %v413_v42 = vsub.f32 %v386_v31, %v403_v41 }
 0x392   :  { %v406_v43 = vpop.xlane.xlu1 %405 }
 0x393   :  { %v417_v44 = vmul.f32 1.442695, %v413_v42  ;;  %v414_v45 = vsub.f32 %v389_v35, %v406_v43 }
 0x394   :  { %v409_v46 = vpop.xlane.xlu0 %408 }
 0x395   :  { %578 = vpow2.f32 %v417_v44  ;;  %v419_v47 = vmul.f32 1.442695, %v414_v45  ;;  %v415_v48 = vsub.f32 %v394_v34, %v409_v46 }
 0x396   :  { %v412_v49 = vpop.xlane.xlu1 %411 }
 0x397   :  { %580 = vpow2.f32 %v419_v47  ;;  %v421_v50 = vmul.f32 1.442695, %v415_v48  ;;  %v416_v51 = vsub.f32 %v397_v37, %v412_v49 }
 0x399   :  { %582 = vpow2.f32 %v421_v50  ;;  %v423_v52 = vmul.f32 1.442695, %v416_v51 }
 0x39b   :  { %584 = vpow2.f32 %v423_v52 }
 0x39f   :  { %v579_v53 = vpop.eup %578 }
 0x3a0   :  { %v425_v54 = vsel %vm400_vm1, %v579_v53, 0.0 }
 0x3a1   :  { %v581_v55 = vpop.eup %580  ;;  %426 = vadd.xlane.f32.xlu0 %v425_v54 }
 0x3a2   :  { %v428_v56 = vsel %vm400_vm1, %v581_v55, 0.0 }
 0x3a3   :  { %v583_v57 = vpop.eup %582  ;;  %429 = vadd.xlane.f32.xlu1 %v428_v56 }
 0x3a4   :  { %v431_v58 = vsel %vm400_vm1, %v583_v57, 0.0 }
 0x3a5   :  { %v585_v59 = vpop.eup %584  ;;  %432 = vadd.xlane.f32.xlu0 %v431_v58 }
 0x3a6   :  { %v434_v60 = vsel %vm400_vm1, %v585_v59, 0.0 }
 0x3a7   :  { %435 = vadd.xlane.f32.xlu1 %v434_v60 }
 0x3a9   :  { %265 = vadd.xlane.f32.xlu0 %v732_v13 }
 0x3ab   :  { %267 = vadd.xlane.f32.xlu1 %v262_v21 }
 0x3ad   :  { %269 = vadd.xlane.f32.xlu0 %v263_v23 }
 0x3af   :  { %271 = vadd.xlane.f32.xlu1 %v264_v27 }
 0x42e   :  { %v427_v61 = vpop.xlane.xlu0 %426 }
 0x42f   :  { %586 = vrcp.f32 %v427_v61 }
 0x430   :  { %v430_v62 = vpop.xlane.xlu1 %429 }
 0x431   :  { %588 = vrcp.f32 %v430_v62 }
 0x432   :  { %v433_v63 = vpop.xlane.xlu0 %432 }
 0x433   :  { %590 = vrcp.f32 %v433_v63 }
 0x434   :  { %v436_v0 = vpop.xlane.xlu1 %435 }
 0x435   :  { %592 = vrcp.f32 %v436_v0 }
 0x436   :  { %v266_v1 = vpop.xlane.xlu0 %265 }
 0x437   :  { %274 = vst.msk [vmem:[%s788_s8] sm:$0xff] %vm273_vm2, %v266_v1 }
 0x438   :  { %v268_v2 = vpop.xlane.xlu1 %267 }
 0x439   :  { %v587_v3 = vpop.eup %586  ;;  %275 = vst.msk [vmem:[%s788_s8 + $0x8] sm:$0xff] %vm273_vm2, %v268_v2 }
 0x43a   :  { %v438_v4 = vmul.f32 %v587_v3, %v579_v53  ;;  %v270_v5 = vpop.xlane.xlu0 %269 }
 0x43b   :  { %v589_v6 = vpop.eup %588  ;;  %276 = vst.msk [vmem:[%s788_s8 + $0x10] sm:$0xff] %vm273_vm2, %v270_v5 }
 0x43c   :  { %445 = vst.msk [vmem:[%s789_s9] sm:$0xff] %vm400_vm1, %v438_v4  ;;  %v440_v7 = vmul.f32 %v589_v6, %v581_v55  ;;  %v272_v8 = vpop.xlane.xlu1 %271 }
 0x43d   :  { %v591_v9 = vpop.eup %590  ;;  %277 = vst.msk [vmem:[%s788_s8 + $0x18] sm:$0xff] %vm273_vm2, %v272_v8 }
 0x43e   :  { %446 = vst.msk [vmem:[%s789_s9 + $0x8] sm:$0xff] %vm400_vm1, %v440_v7  ;;  %v442_v10 = vmul.f32 %v591_v9, %v583_v57 }
 0x43f   :  { %v593_v11 = vpop.eup %592 }
 0x440   :  { %447 = vst.msk [vmem:[%s789_s9 + $0x10] sm:$0xff] %vm400_vm1, %v442_v10  ;;  %v444_v12 = vmul.f32 %v593_v11, %v585_v59 }
 0x442   :  { %448 = vst.msk [vmem:[%s789_s9 + $0x18] sm:$0xff] %vm400_vm1, %v444_v12 }

</bundles_post_ra>
